<compile_context>
chip_gen: v7x
topology: tpu7x:2x2x1
jax: 0.10.0
libtpu: 0.0.40
codegen_flags: <defaults>
</compile_context>

<pallas_src>
import jax
import jax.numpy as jnp
import numpy as np
from jax.experimental import pallas as pl
from jax.experimental.pallas import tpu as pltpu

EPS = 1e-5                             # PyTorch BatchNorm2d default
LANE = 128                             # TPU lane width
VMEM_LIMIT_BYTES = 48 * 1024 * 1024    # explicit budget, headroom under v7x 64 MiB


# ------------------------------ small helpers -------------------------------

def _round_up(x, m):
    return (x + m - 1) // m * m


def _pick_tm(m):
    """Rows per grid step: big tiles amortize the ~0.35us/step overhead and
    approach HBM roofline, while double-buffered tiles stay far below VMEM."""
    for tm in (512, 256, 128, 64):
        if m >= 2 * tm:
            return tm
    return _round_up(max(m, 8), 8)


def _mosaic_params(semantics):
    return pltpu.CompilerParams(
        dimension_semantics=semantics,
        vmem_limit_bytes=VMEM_LIMIT_BYTES)


def _pad2d(a, rows, cols):
    r, c = a.shape
    return jnp.pad(a, ((0, rows - r), (0, cols - c)))


# ------------------------------ Pallas kernels -------------------------------

def _mm_stats_kernel(p_ref, w_ref, y_ref, sum_ref, sq_ref):
    """y = patches @ W (bf16 x bf16 -> f32 accum); accumulate per-channel
    sum / sum-of-squares globally across the M grid axis."""
    y = jnp.dot(p_ref[...], w_ref[...], preferred_element_type=jnp.float32)
    y_ref[...] = y

    @pl.when(pl.program_id(0) == 0)
    def _():
        sum_ref[...] = jnp.zeros_like(sum_ref)
        sq_ref[...] = jnp.zeros_like(sq_ref)

    sum_ref[...] += jnp.sum(y, axis=0, keepdims=True)
    sq_ref[...] += jnp.sum(y * y, axis=0, keepdims=True)


def _mm2_stats_kernel(p_ref, psc_ref, w_ref, wsc_ref,
                      y_ref, ysc_ref, sum_ref, sq_ref, sumsc_ref, sqsc_ref):
    """conv1 (3x3) and the 1x1 shortcut conv fused into one pass over the same
    row tiles, each with its own global sum/sumsq accumulators."""
    y = jnp.dot(p_ref[...], w_ref[...], preferred_element_type=jnp.float32)
    ysc = jnp.dot(psc_ref[...], wsc_ref[...], preferred_element_type=jnp.float32)
    y_ref[...] = y
    ysc_ref[...] = ysc

    @pl.when(pl.program_id(0) == 0)
    def _():
        sum_ref[...] = jnp.zeros_like(sum_ref)
        sq_ref[...] = jnp.zeros_like(sq_ref)
        sumsc_ref[...] = jnp.zeros_like(sumsc_ref)
        sqsc_ref[...] = jnp.zeros_like(sqsc_ref)

    sum_ref[...] += jnp.sum(y, axis=0, keepdims=True)
    sq_ref[...] += jnp.sum(y * y, axis=0, keepdims=True)
    sumsc_ref[...] += jnp.sum(ysc, axis=0, keepdims=True)
    sqsc_ref[...] += jnp.sum(ysc * ysc, axis=0, keepdims=True)


def _bn_relu_kernel(y_ref, s_ref, b_ref, o_ref):
    """out = relu(y * scale + shift)  (f32 epilogue, lane-dense store)."""
    o_ref[...] = jnp.maximum(
        y_ref[...] * s_ref[...] + b_ref[...], 0.0).astype(o_ref.dtype)


def _bn_add_relu_kernel(y_ref, r_ref, s_ref, b_ref, rs_ref, rb_ref, o_ref):
    """out = relu(bn(y) + bn(residual)); identity residual uses rs=1, rb=0."""
    y = y_ref[...] * s_ref[...] + b_ref[...]
    r = r_ref[...] * rs_ref[...] + rb_ref[...]
    o_ref[...] = jnp.maximum(y + r, 0.0).astype(o_ref.dtype)


# --------------------------- pallas_call wrappers ----------------------------

def _conv_stats(patches, w, tm):
    mpad, kpad = patches.shape
    cpad = w.shape[1]
    nm = mpad // tm
    row = lambda i: (i, 0)
    const = lambda i: (0, 0)
    return pl.pallas_call(
        _mm_stats_kernel,
        out_shape=(jax.ShapeDtypeStruct((mpad, cpad), jnp.float32),
                   jax.ShapeDtypeStruct((1, cpad), jnp.float32),
                   jax.ShapeDtypeStruct((1, cpad), jnp.float32)),
        grid_spec=pltpu.PrefetchScalarGridSpec(
            num_scalar_prefetch=0,
            grid=(nm,),
            in_specs=[pl.BlockSpec((tm, kpad), row),
                      pl.BlockSpec((kpad, cpad), const)],   # VMEM-resident weight
            out_specs=[pl.BlockSpec((tm, cpad), row),
                       pl.BlockSpec((1, cpad), const),      # sum accumulator
                       pl.BlockSpec((1, cpad), const)]),    # sumsq accumulator
        compiler_params=_mosaic_params(("arbitrary",)),      # accumulators carried
    )(patches, w)


def _conv_stats_fused(p1, psc, w1, wsc, tm):
    mpad, k1 = p1.shape
    ksc = psc.shape[1]
    cpad = w1.shape[1]
    nm = mpad // tm
    row = lambda i: (i, 0)
    const = lambda i: (0, 0)
    return pl.pallas_call(
        _mm2_stats_kernel,
        out_shape=(jax.ShapeDtypeStruct((mpad, cpad), jnp.float32),
                   jax.ShapeDtypeStruct((mpad, cpad), jnp.float32),
                   jax.ShapeDtypeStruct((1, cpad), jnp.float32),
                   jax.ShapeDtypeStruct((1, cpad), jnp.float32),
                   jax.ShapeDtypeStruct((1, cpad), jnp.float32),
                   jax.ShapeDtypeStruct((1, cpad), jnp.float32)),
        grid_spec=pltpu.PrefetchScalarGridSpec(
            num_scalar_prefetch=0,
            grid=(nm,),
            in_specs=[pl.BlockSpec((tm, k1), row),
                      pl.BlockSpec((tm, ksc), row),
                      pl.BlockSpec((k1, cpad), const),
                      pl.BlockSpec((ksc, cpad), const)],
            out_specs=[pl.BlockSpec((tm, cpad), row),
                       pl.BlockSpec((tm, cpad), row),
                       pl.BlockSpec((1, cpad), const),
                       pl.BlockSpec((1, cpad), const),
                       pl.BlockSpec((1, cpad), const),
                       pl.BlockSpec((1, cpad), const)]),
        compiler_params=_mosaic_params(("arbitrary",)),
    )(p1, psc, w1, wsc)


def _bn_relu(y, scale, shift, tm, out_dtype):
    mpad, cpad = y.shape
    nm = mpad // tm
    row = lambda i: (i, 0)
    const = lambda i: (0, 0)
    return pl.pallas_call(
        _bn_relu_kernel,
        out_shape=jax.ShapeDtypeStruct((mpad, cpad), out_dtype),
        grid_spec=pltpu.PrefetchScalarGridSpec(
            num_scalar_prefetch=0,
            grid=(nm,),
            in_specs=[pl.BlockSpec((tm, cpad), row),
                      pl.BlockSpec((1, cpad), const),
                      pl.BlockSpec((1, cpad), const)],
            out_specs=pl.BlockSpec((tm, cpad), row)),
        compiler_params=_mosaic_params(("parallel",)),
    )(y, scale, shift)


def _bn_add_relu(y, res, scale, shift, rscale, rshift, tm):
    mpad, cpad = y.shape
    nm = mpad // tm
    row = lambda i: (i, 0)
    const = lambda i: (0, 0)
    return pl.pallas_call(
        _bn_add_relu_kernel,
        out_shape=jax.ShapeDtypeStruct((mpad, cpad), jnp.float32),
        grid_spec=pltpu.PrefetchScalarGridSpec(
            num_scalar_prefetch=0,
            grid=(nm,),
            in_specs=[pl.BlockSpec((tm, cpad), row),
                      pl.BlockSpec((tm, cpad), row),
                      pl.BlockSpec((1, cpad), const),
                      pl.BlockSpec((1, cpad), const),
                      pl.BlockSpec((1, cpad), const),
                      pl.BlockSpec((1, cpad), const)],
            out_specs=pl.BlockSpec((tm, cpad), row)),
        compiler_params=_mosaic_params(("parallel",)),
    )(y, res, scale, shift, rscale, rshift)


# -------------------------------- JAX glue -----------------------------------

def _im2col(x_nhwc, ksize, stride, pad):
    """Extract conv patches. Returns ((N*Ho*Wo, K*K*C), (N, Ho, Wo))."""
    N, H, W, C = x_nhwc.shape
    xp = jnp.pad(x_nhwc, ((0, 0), (pad, pad), (pad, pad), (0, 0)))
    Ho = (H + 2 * pad - ksize) // stride + 1
    Wo = (W + 2 * pad - ksize) // stride + 1
    cols = []
    for kh in range(ksize):
        for kw in range(ksize):
            cols.append(
                xp[:, kh:kh + Ho * stride:stride, kw:kw + Wo * stride:stride, :])
    patches = jnp.concatenate(cols, axis=-1)   # column order: (kh, kw, cin)
    return patches.reshape(N * Ho * Wo, ksize * ksize * C), (N, Ho, Wo)


def _flatten_w(w_oihw):
    """(Cout, Cin, KH, KW) -> (KH*KW*Cin, Cout); matches _im2col column order."""
    cout = w_oihw.shape[0]
    return jnp.transpose(w_oihw, (2, 3, 1, 0)).reshape(-1, cout)


def _bn_scale_shift(ch_sum, ch_sumsq, gamma_p, beta_p, m):
    """Finalize train-mode BN: biased variance over the real M rows.
    Zero-padded patch rows contribute 0 to both sums, so dividing by the real
    M yields exact global statistics."""
    mean = ch_sum / m
    var = jnp.maximum(ch_sumsq / m - mean * mean, 0.0)
    scale = gamma_p * jax.lax.rsqrt(var + EPS)
    shift = beta_p - mean * scale
    return scale, shift


def init_basic_block(key, in_channels, out_channels, stride=1):
    k1, k2, k3 = jax.random.split(key, 3)
    params = {
        "w1": jax.random.normal(k1, (out_channels, in_channels, 3, 3), jnp.float32) * 0.1,
        "g1": jnp.ones((out_channels,), jnp.float32),
        "b1": jnp.zeros((out_channels,), jnp.float32),
        "w2": jax.random.normal(k2, (out_channels, out_channels, 3, 3), jnp.float32) * 0.1,
        "g2": jnp.ones((out_channels,), jnp.float32),
        "b2": jnp.zeros((out_channels,), jnp.float32),
        "stride": stride,
        "has_shortcut": (stride != 1) or (in_channels != out_channels),
    }
    if params["has_shortcut"]:
        params["wsc"] = jax.random.normal(
            k3, (out_channels, in_channels, 1, 1), jnp.float32) * 0.1
        params["gsc"] = jnp.ones((out_channels,), jnp.float32)
        params["bsc"] = jnp.zeros((out_channels,), jnp.float32)
    return params


def basic_block_forward(params, x_nchw):
    stride = params["stride"]
    cin = params["w1"].shape[1]
    cout = params["w1"].shape[0]
    cpad = _round_up(cout, LANE)

    x = jnp.transpose(x_nchw, (0, 2, 3, 1)).astype(jnp.float32)  # NCHW -> NHWC
    x_bf = x.astype(jnp.bfloat16)          # MXU operands in bf16, accum in f32

    # ---- pass 1: conv1 (3x3, stride, pad=1) [+ fused 1x1 shortcut conv] ----
    p1, (N, Ho, Wo) = _im2col(x_bf, 3, stride, 1)
    M = N * Ho * Wo
    tm = _pick_tm(M)
    mpad = _round_up(M, tm)

    k1p = _round_up(9 * cin, LANE)
    p1 = _pad2d(p1, mpad, k1p)
    w1 = _pad2d(_flatten_w(params["w1"]), k1p, cpad).astype(jnp.bfloat16)
    g1 = _pad2d(params["g1"].reshape(1, -1), 1, cpad)
    b1 = _pad2d(params["b1"].reshape(1, -1), 1, cpad)

    if params["has_shortcut"]:
        kscp = _round_up(cin, LANE)
        psc, _ = _im2col(x_bf, 1, stride, 0)     # 1x1 patches == center taps of x
        psc = _pad2d(psc, mpad, kscp)
        wsc = _pad2d(_flatten_w(params["wsc"]), kscp, cpad).astype(jnp.bfloat16)
        y1, ysc, s1, q1, ssc, qsc = _conv_stats_fused(p1, psc, w1, wsc, tm)
        gsc = _pad2d(params["gsc"].reshape(1, -1), 1, cpad)
        bsc = _pad2d(params["bsc"].reshape(1, -1), 1, cpad)
        rscale, rshift = _bn_scale_shift(ssc, qsc, gsc, bsc, M)
        res = ysc                                # BN applied in the final pass
    else:
        # Identity shortcut is only valid when stride==1 and Cin==Cout.
        assert stride == 1 and cin == cout
        y1, s1, q1 = _conv_stats(p1, w1, tm)
        res = _pad2d(x.reshape(M, cin), mpad, cpad)       # f32 identity residual
        rscale = jnp.ones((1, cpad), jnp.float32)
        rshift = jnp.zeros((1, cpad), jnp.float32)

    scale1, shift1 = _bn_scale_shift(s1, q1, g1, b1, M)
    h1 = _bn_relu(y1, scale1, shift1, tm, jnp.bfloat16)   # bf16: feeds next matmul

    # ---- pass 2: conv2 (3x3, stride=1, pad=1) + bn2 + residual + relu ------
    h1_img = h1[:M, :cout].reshape(N, Ho, Wo, cout)
    p2, _ = _im2col(h1_img, 3, 1, 1)
    k2p = _round_up(9 * cout, LANE)
    p2 = _pad2d(p2, mpad, k2p)
    w2 = _pad2d(_flatten_w(params["w2"]), k2p, cpad).astype(jnp.bfloat16)
    g2 = _pad2d(params["g2"].reshape(1, -1), 1, cpad)
    b2 = _pad2d(params["b2"].reshape(1, -1), 1, cpad)

    y2, s2, q2 = _conv_stats(p2, w2, tm)
    scale2, shift2 = _bn_scale_shift(s2, q2, g2, b2, M)

    out = _bn_add_relu(y2, res, scale2, shift2, rscale, rshift, tm)
    out = out[:M, :cout].reshape(N, Ho, Wo, cout)
    return jnp.transpose(out, (0, 3, 1, 2))               # NHWC -> NCHW


# ---------------------------- pure-JAX reference ------------------------------

def _ref_forward(params, x):
    def conv(x, w, stride, pad):
        return jax.lax.conv_general_dilated(
            x, w, (stride, stride), [(pad, pad), (pad, pad)],
            dimension_numbers=("NCHW", "OIHW", "NCHW"),
            precision=jax.lax.Precision.HIGHEST)

    def bn(y, g, b):
        mean = jnp.mean(y, axis=(0, 2, 3), keepdims=True)
        var = jnp.mean(jnp.square(y - mean), axis=(0, 2, 3), keepdims=True)
        return ((y - mean) * jax.lax.rsqrt(var + EPS)
                * g.reshape(1, -1, 1, 1) + b.reshape(1, -1, 1, 1))

    s = params["stride"]
    out = jax.nn.relu(bn(conv(x, params["w1"], s, 1), params["g1"], params["b1"]))
    out = bn(conv(out, params["w2"], 1, 1), params["g2"], params["b2"])
    if params["has_shortcut"]:
        sc = bn(conv(x, params["wsc"], s, 0), params["gsc"], params["bsc"])
    else:
        sc = x
    return jax.nn.relu(out + sc)


if __name__ == "__main__":
    key = jax.random.PRNGKey(0)
    kx, kp, kp2 = jax.random.split(key, 3)

    # bf16 MXU operands (f32 accumulation) vs the f32 reference => widened tol.
    ATOL = RTOL = 5e-2

    # Config A: stride!=1 and Cin!=Cout -> exercises the fused shortcut conv+BN.
    N, Cin, H, W = 2, 4, 16, 16
    Cout, stride = 8, 2
    x = jax.random.normal(kx, (N, Cin, H, W), jnp.float32)
    params = init_basic_block(kp, Cin, Cout, stride)
    fwd = jax.jit(lambda inp: basic_block_forward(params, inp))
    out = jax.block_until_ready(fwd(x))
    assert out.shape == (N, Cout, H // stride, W // stride), out.shape
    ref = jax.block_until_ready(_ref_forward(params, x))
    np.testing.assert_allclose(np.asarray(out), np.asarray(ref),
                               atol=ATOL, rtol=RTOL)

    # Config B: stride==1 and Cin==Cout -> identity-shortcut path.
    params_b = init_basic_block(kp2, Cout, Cout, 1)
    x_b = jax.random.normal(kx, (N, Cout, H, W), jnp.float32)
    fwd_b = jax.jit(lambda inp: basic_block_forward(params_b, inp))
    out_b = jax.block_until_ready(fwd_b(x_b))
    ref_b = jax.block_until_ready(_ref_forward(params_b, x_b))
    np.testing.assert_allclose(np.asarray(out_b), np.asarray(ref_b),
                               atol=ATOL, rtol=RTOL)

    print("KERNEL_OK")
</pallas_src>

<mosaic_0001>
module attributes {stable_mosaic.version = 11 : i64} {
  func.func @_mm2_stats_kernel(%arg0: i32, %arg1: memref<64x128xbf16, #tpu.memory_space<vmem>>, %arg2: memref<64x128xbf16, #tpu.memory_space<vmem>>, %arg3: memref<128x128xbf16, #tpu.memory_space<vmem>>, %arg4: memref<128x128xbf16, #tpu.memory_space<vmem>>, %arg5: memref<64x128xf32, #tpu.memory_space<vmem>>, %arg6: memref<64x128xf32, #tpu.memory_space<vmem>>, %arg7: memref<1x128xf32, #tpu.memory_space<vmem>>, %arg8: memref<1x128xf32, #tpu.memory_space<vmem>>, %arg9: memref<1x128xf32, #tpu.memory_space<vmem>>, %arg10: memref<1x128xf32, #tpu.memory_space<vmem>>) attributes {dimension_semantics = [#tpu.dimension_semantics<arbitrary>], iteration_bounds = array<i64: 2>, scalar_prefetch = 0 : i64, scratch_operands = 0 : i64, tpu.core_type = #tpu.core_type<tc>, window_params = [{transform_indices = @transform_0, window_bounds = array<i64: 64, 128>}, {transform_indices = @transform_1, window_bounds = array<i64: 64, 128>}, {pipeline_mode = #tpu.pipeline_mode<synchronous>, transform_indices = @transform_2, window_bounds = array<i64: 128, 128>}, {pipeline_mode = #tpu.pipeline_mode<synchronous>, transform_indices = @transform_3, window_bounds = array<i64: 128, 128>}, {transform_indices = @transform_4, window_bounds = array<i64: 64, 128>}, {transform_indices = @transform_5, window_bounds = array<i64: 64, 128>}, {pipeline_mode = #tpu.pipeline_mode<synchronous>, transform_indices = @transform_6, window_bounds = array<i64: 1, 128>}, {pipeline_mode = #tpu.pipeline_mode<synchronous>, transform_indices = @transform_7, window_bounds = array<i64: 1, 128>}, {pipeline_mode = #tpu.pipeline_mode<synchronous>, transform_indices = @transform_8, window_bounds = array<i64: 1, 128>}, {pipeline_mode = #tpu.pipeline_mode<synchronous>, transform_indices = @transform_9, window_bounds = array<i64: 1, 128>}]} {
    %c0 = arith.constant 0 : index
    %c0_0 = arith.constant 0 : index
    %0 = vector.load %arg1[%c0, %c0_0] : memref<64x128xbf16, #tpu.memory_space<vmem>>, vector<64x128xbf16>
    %c0_1 = arith.constant 0 : index
    %c0_2 = arith.constant 0 : index
    %1 = vector.load %arg3[%c0_1, %c0_2] : memref<128x128xbf16, #tpu.memory_space<vmem>>, vector<128x128xbf16>
    %cst = arith.constant dense<0.000000e+00> : vector<64x128xf32>
    %2 = tpu.matmul %0, %1, %cst {dimension_numbers = #tpu.dot_dimension_numbers<[1], [0], [0], [1], [0, 0, 1, 1], [], []>} : vector<64x128xbf16>, vector<128x128xbf16>, vector<64x128xf32> -> vector<64x128xf32>
    %c0_3 = arith.constant 0 : index
    %c0_4 = arith.constant 0 : index
    %3 = vector.load %arg2[%c0_3, %c0_4] : memref<64x128xbf16, #tpu.memory_space<vmem>>, vector<64x128xbf16>
    %c0_5 = arith.constant 0 : index
    %c0_6 = arith.constant 0 : index
    %4 = vector.load %arg4[%c0_5, %c0_6] : memref<128x128xbf16, #tpu.memory_space<vmem>>, vector<128x128xbf16>
    %cst_7 = arith.constant dense<0.000000e+00> : vector<64x128xf32>
    %5 = tpu.matmul %3, %4, %cst_7 {dimension_numbers = #tpu.dot_dimension_numbers<[1], [0], [0], [1], [0, 0, 1, 1], [], []>} : vector<64x128xbf16>, vector<128x128xbf16>, vector<64x128xf32> -> vector<64x128xf32>
    %c0_8 = arith.constant 0 : index
    %c0_9 = arith.constant 0 : index
    %6 = vector.load %arg5[%c0_8, %c0_9] : memref<64x128xf32, #tpu.memory_space<vmem>>, vector<64x128xf32>
    tpu.vector_store %arg5[%c0_8, %c0_9], %2 {strides = array<i32>} : memref<64x128xf32, #tpu.memory_space<vmem>>, vector<64x128xf32>,
    %c0_10 = arith.constant 0 : index
    %c0_11 = arith.constant 0 : index
    %7 = vector.load %arg6[%c0_10, %c0_11] : memref<64x128xf32, #tpu.memory_space<vmem>>, vector<64x128xf32>
    tpu.vector_store %arg6[%c0_10, %c0_11], %5 {strides = array<i32>} : memref<64x128xf32, #tpu.memory_space<vmem>>, vector<64x128xf32>,
    %c0_i32 = arith.constant 0 : i32
    %8 = arith.cmpi eq, %arg0, %c0_i32 : i32
    %9 = arith.extui %8 : i1 to i32
    %c0_i32_12 = arith.constant 0 : i32
    %10 = arith.cmpi ne, %9, %c0_i32_12 : i32
    scf.if %10 {
      %cst_33 = arith.constant 0.000000e+00 : f32
      %33 = vector.broadcast %cst_33 : f32 to vector<1x128xf32>
      %c0_34 = arith.constant 0 : index
      %c0_35 = arith.constant 0 : index
      %34 = vector.load %arg7[%c0_34, %c0_35] : memref<1x128xf32, #tpu.memory_space<vmem>>, vector<1x128xf32>
      tpu.vector_store %arg7[%c0_34, %c0_35], %33 {strides = array<i32>} : memref<1x128xf32, #tpu.memory_space<vmem>>, vector<1x128xf32>,
      %cst_36 = arith.constant 0.000000e+00 : f32
      %35 = vector.broadcast %cst_36 : f32 to vector<1x128xf32>
      %c0_37 = arith.constant 0 : index
      %c0_38 = arith.constant 0 : index
      %36 = vector.load %arg8[%c0_37, %c0_38] : memref<1x128xf32, #tpu.memory_space<vmem>>, vector<1x128xf32>
      tpu.vector_store %arg8[%c0_37, %c0_38], %35 {strides = array<i32>} : memref<1x128xf32, #tpu.memory_space<vmem>>, vector<1x128xf32>,
      %cst_39 = arith.constant 0.000000e+00 : f32
      %37 = vector.broadcast %cst_39 : f32 to vector<1x128xf32>
      %c0_40 = arith.constant 0 : index
      %c0_41 = arith.constant 0 : index
      %38 = vector.load %arg9[%c0_40, %c0_41] : memref<1x128xf32, #tpu.memory_space<vmem>>, vector<1x128xf32>
      tpu.vector_store %arg9[%c0_40, %c0_41], %37 {strides = array<i32>} : memref<1x128xf32, #tpu.memory_space<vmem>>, vector<1x128xf32>,
      %cst_42 = arith.constant 0.000000e+00 : f32
      %39 = vector.broadcast %cst_42 : f32 to vector<1x128xf32>
      %c0_43 = arith.constant 0 : index
      %c0_44 = arith.constant 0 : index
      %40 = vector.load %arg10[%c0_43, %c0_44] : memref<1x128xf32, #tpu.memory_space<vmem>>, vector<1x128xf32>
      tpu.vector_store %arg10[%c0_43, %c0_44], %39 {strides = array<i32>} : memref<1x128xf32, #tpu.memory_space<vmem>>, vector<1x128xf32>,
    } else {
    }
    %c0_13 = arith.constant 0 : index
    %c0_14 = arith.constant 0 : index
    %11 = vector.load %arg7[%c0_13, %c0_14] : memref<1x128xf32, #tpu.memory_space<vmem>>, vector<1x128xf32>
    %cst_15 = arith.constant dense<0.000000e+00> : vector<128xf32>
    %12 = vector.multi_reduction <add>, %2, %cst_15 [0] : vector<64x128xf32> to vector<128xf32>
    %13 = vector.shape_cast %12 : vector<128xf32> to vector<1x128xf32>
    %14 = arith.addf %11, %13 : vector<1x128xf32>
    %c0_16 = arith.constant 0 : index
    %c0_17 = arith.constant 0 : index
    %15 = vector.load %arg7[%c0_16, %c0_17] : memref<1x128xf32, #tpu.memory_space<vmem>>, vector<1x128xf32>
    tpu.vector_store %arg7[%c0_16, %c0_17], %14 {strides = array<i32>} : memref<1x128xf32, #tpu.memory_space<vmem>>, vector<1x128xf32>,
    %c0_18 = arith.constant 0 : index
    %c0_19 = arith.constant 0 : index
    %16 = vector.load %arg8[%c0_18, %c0_19] : memref<1x128xf32, #tpu.memory_space<vmem>>, vector<1x128xf32>
    %17 = arith.mulf %2, %2 : vector<64x128xf32>
    %cst_20 = arith.constant dense<0.000000e+00> : vector<128xf32>
    %18 = vector.multi_reduction <add>, %17, %cst_20 [0] : vector<64x128xf32> to vector<128xf32>
    %19 = vector.shape_cast %18 : vector<128xf32> to vector<1x128xf32>
    %20 = arith.addf %16, %19 : vector<1x128xf32>
    %c0_21 = arith.constant 0 : index
    %c0_22 = arith.constant 0 : index
    %21 = vector.load %arg8[%c0_21, %c0_22] : memref<1x128xf32, #tpu.memory_space<vmem>>, vector<1x128xf32>
    tpu.vector_store %arg8[%c0_21, %c0_22], %20 {strides = array<i32>} : memref<1x128xf32, #tpu.memory_space<vmem>>, vector<1x128xf32>,
    %c0_23 = arith.constant 0 : index
    %c0_24 = arith.constant 0 : index
    %22 = vector.load %arg9[%c0_23, %c0_24] : memref<1x128xf32, #tpu.memory_space<vmem>>, vector<1x128xf32>
    %cst_25 = arith.constant dense<0.000000e+00> : vector<128xf32>
    %23 = vector.multi_reduction <add>, %5, %cst_25 [0] : vector<64x128xf32> to vector<128xf32>
    %24 = vector.shape_cast %23 : vector<128xf32> to vector<1x128xf32>
    %25 = arith.addf %22, %24 : vector<1x128xf32>
    %c0_26 = arith.constant 0 : index
    %c0_27 = arith.constant 0 : index
    %26 = vector.load %arg9[%c0_26, %c0_27] : memref<1x128xf32, #tpu.memory_space<vmem>>, vector<1x128xf32>
    tpu.vector_store %arg9[%c0_26, %c0_27], %25 {strides = array<i32>} : memref<1x128xf32, #tpu.memory_space<vmem>>, vector<1x128xf32>,
    %c0_28 = arith.constant 0 : index
    %c0_29 = arith.constant 0 : index
    %27 = vector.load %arg10[%c0_28, %c0_29] : memref<1x128xf32, #tpu.memory_space<vmem>>, vector<1x128xf32>
    %28 = arith.mulf %5, %5 : vector<64x128xf32>
    %cst_30 = arith.constant dense<0.000000e+00> : vector<128xf32>
    %29 = vector.multi_reduction <add>, %28, %cst_30 [0] : vector<64x128xf32> to vector<128xf32>
    %30 = vector.shape_cast %29 : vector<128xf32> to vector<1x128xf32>
    %31 = arith.addf %27, %30 : vector<1x128xf32>
    %c0_31 = arith.constant 0 : index
    %c0_32 = arith.constant 0 : index
    %32 = vector.load %arg10[%c0_31, %c0_32] : memref<1x128xf32, #tpu.memory_space<vmem>>, vector<1x128xf32>
    tpu.vector_store %arg10[%c0_31, %c0_32], %31 {strides = array<i32>} : memref<1x128xf32, #tpu.memory_space<vmem>>, vector<1x128xf32>,
    return
  }
  func.func @transform_0(%arg0: i32) -> (i32, i32) {
    %c0_i32 = arith.constant 0 : i32
    %c0_i32_0 = arith.constant 0 : i32
    return %arg0, %c0_i32 : i32, i32
  }
  func.func @transform_1(%arg0: i32) -> (i32, i32) {
    %c0_i32 = arith.constant 0 : i32
    %c0_i32_0 = arith.constant 0 : i32
    return %arg0, %c0_i32 : i32, i32
  }
  func.func @transform_2(%arg0: i32) -> (i32, i32) {
    %c0_i32 = arith.constant 0 : i32
    %c0_i32_0 = arith.constant 0 : i32
    %c0_i32_1 = arith.constant 0 : i32
    return %c0_i32, %c0_i32_0 : i32, i32
  }
  func.func @transform_3(%arg0: i32) -> (i32, i32) {
    %c0_i32 = arith.constant 0 : i32
    %c0_i32_0 = arith.constant 0 : i32
    %c0_i32_1 = arith.constant 0 : i32
    return %c0_i32, %c0_i32_0 : i32, i32
  }
  func.func @transform_4(%arg0: i32) -> (i32, i32) {
    %c0_i32 = arith.constant 0 : i32
    %c0_i32_0 = arith.constant 0 : i32
    return %arg0, %c0_i32 : i32, i32
  }
  func.func @transform_5(%arg0: i32) -> (i32, i32) {
    %c0_i32 = arith.constant 0 : i32
    %c0_i32_0 = arith.constant 0 : i32
    return %arg0, %c0_i32 : i32, i32
  }
  func.func @transform_6(%arg0: i32) -> (i32, i32) {
    %c0_i32 = arith.constant 0 : i32
    %c0_i32_0 = arith.constant 0 : i32
    %c0_i32_1 = arith.constant 0 : i32
    return %c0_i32, %c0_i32_0 : i32, i32
  }
  func.func @transform_7(%arg0: i32) -> (i32, i32) {
    %c0_i32 = arith.constant 0 : i32
    %c0_i32_0 = arith.constant 0 : i32
    %c0_i32_1 = arith.constant 0 : i32
    return %c0_i32, %c0_i32_0 : i32, i32
  }
  func.func @transform_8(%arg0: i32) -> (i32, i32) {
    %c0_i32 = arith.constant 0 : i32
    %c0_i32_0 = arith.constant 0 : i32
    %c0_i32_1 = arith.constant 0 : i32
    return %c0_i32, %c0_i32_0 : i32, i32
  }
  func.func @transform_9(%arg0: i32) -> (i32, i32) {
    %c0_i32 = arith.constant 0 : i32
    %c0_i32_0 = arith.constant 0 : i32
    %c0_i32_1 = arith.constant 0 : i32
    return %c0_i32, %c0_i32_0 : i32, i32
  }
}

module attributes {stable_mosaic.version = 11 : i64} {
  func.func @_bn_relu_kernel(%arg0: i32, %arg1: memref<64x128xf32, #tpu.memory_space<vmem>>, %arg2: memref<1x128xf32, #tpu.memory_space<vmem>>, %arg3: memref<1x128xf32, #tpu.memory_space<vmem>>, %arg4: memref<64x128xbf16, #tpu.memory_space<vmem>>) attributes {dimension_semantics = [#tpu.dimension_semantics<parallel>], iteration_bounds = array<i64: 2>, scalar_prefetch = 0 : i64, scratch_operands = 0 : i64, tpu.core_type = #tpu.core_type<tc>, window_params = [{transform_indices = @transform_0, window_bounds = array<i64: 64, 128>}, {pipeline_mode = #tpu.pipeline_mode<synchronous>, transform_indices = @transform_1, window_bounds = array<i64: 1, 128>}, {pipeline_mode = #tpu.pipeline_mode<synchronous>, transform_indices = @transform_2, window_bounds = array<i64: 1, 128>}, {transform_indices = @transform_3, window_bounds = array<i64: 64, 128>}]} {
    %c0 = arith.constant 0 : index
    %c0_0 = arith.constant 0 : index
    %0 = vector.load %arg1[%c0, %c0_0] : memref<64x128xf32, #tpu.memory_space<vmem>>, vector<64x128xf32>
    %c0_1 = arith.constant 0 : index
    %c0_2 = arith.constant 0 : index
    %1 = vector.load %arg2[%c0_1, %c0_2] : memref<1x128xf32, #tpu.memory_space<vmem>>, vector<1x128xf32>
    %2 = vector.broadcast %1 : vector<1x128xf32> to vector<64x128xf32>
    %3 = arith.mulf %0, %2 : vector<64x128xf32>
    %c0_3 = arith.constant 0 : index
    %c0_4 = arith.constant 0 : index
    %4 = vector.load %arg3[%c0_3, %c0_4] : memref<1x128xf32, #tpu.memory_space<vmem>>, vector<1x128xf32>
    %5 = vector.broadcast %4 : vector<1x128xf32> to vector<64x128xf32>
    %6 = arith.addf %3, %5 : vector<64x128xf32>
    %cst = arith.constant 0.000000e+00 : f32
    %7 = vector.broadcast %cst : f32 to vector<64x128xf32>
    %8 = arith.maximumf %6, %7 : vector<64x128xf32>
    %9 = arith.truncf %8 : vector<64x128xf32> to vector<64x128xbf16>
    %c0_5 = arith.constant 0 : index
    %c0_6 = arith.constant 0 : index
    %10 = vector.load %arg4[%c0_5, %c0_6] : memref<64x128xbf16, #tpu.memory_space<vmem>>, vector<64x128xbf16>
    tpu.vector_store %arg4[%c0_5, %c0_6], %9 {strides = array<i32>} : memref<64x128xbf16, #tpu.memory_space<vmem>>, vector<64x128xbf16>,
    return
  }
  func.func @transform_0(%arg0: i32) -> (i32, i32) {
    %c0_i32 = arith.constant 0 : i32
    %c0_i32_0 = arith.constant 0 : i32
    return %arg0, %c0_i32 : i32, i32
  }
  func.func @transform_1(%arg0: i32) -> (i32, i32) {
    %c0_i32 = arith.constant 0 : i32
    %c0_i32_0 = arith.constant 0 : i32
    %c0_i32_1 = arith.constant 0 : i32
    return %c0_i32, %c0_i32_0 : i32, i32
  }
  func.func @transform_2(%arg0: i32) -> (i32, i32) {
    %c0_i32 = arith.constant 0 : i32
    %c0_i32_0 = arith.constant 0 : i32
    %c0_i32_1 = arith.constant 0 : i32
    return %c0_i32, %c0_i32_0 : i32, i32
  }
  func.func @transform_3(%arg0: i32) -> (i32, i32) {
    %c0_i32 = arith.constant 0 : i32
    %c0_i32_0 = arith.constant 0 : i32
    return %arg0, %c0_i32 : i32, i32
  }
}

module attributes {stable_mosaic.version = 11 : i64} {
  func.func @_mm_stats_kernel(%arg0: i32, %arg1: memref<64x128xbf16, #tpu.memory_space<vmem>>, %arg2: memref<128x128xbf16, #tpu.memory_space<vmem>>, %arg3: memref<64x128xf32, #tpu.memory_space<vmem>>, %arg4: memref<1x128xf32, #tpu.memory_space<vmem>>, %arg5: memref<1x128xf32, #tpu.memory_space<vmem>>) attributes {dimension_semantics = [#tpu.dimension_semantics<arbitrary>], iteration_bounds = array<i64: 2>, scalar_prefetch = 0 : i64, scratch_operands = 0 : i64, tpu.core_type = #tpu.core_type<tc>, window_params = [{transform_indices = @transform_0, window_bounds = array<i64: 64, 128>}, {pipeline_mode = #tpu.pipeline_mode<synchronous>, transform_indices = @transform_1, window_bounds = array<i64: 128, 128>}, {transform_indices = @transform_2, window_bounds = array<i64: 64, 128>}, {pipeline_mode = #tpu.pipeline_mode<synchronous>, transform_indices = @transform_3, window_bounds = array<i64: 1, 128>}, {pipeline_mode = #tpu.pipeline_mode<synchronous>, transform_indices = @transform_4, window_bounds = array<i64: 1, 128>}]} {
    %c0 = arith.constant 0 : index
    %c0_0 = arith.constant 0 : index
    %0 = vector.load %arg1[%c0, %c0_0] : memref<64x128xbf16, #tpu.memory_space<vmem>>, vector<64x128xbf16>
    %c0_1 = arith.constant 0 : index
    %c0_2 = arith.constant 0 : index
    %1 = vector.load %arg2[%c0_1, %c0_2] : memref<128x128xbf16, #tpu.memory_space<vmem>>, vector<128x128xbf16>
    %cst = arith.constant dense<0.000000e+00> : vector<64x128xf32>
    %2 = tpu.matmul %0, %1, %cst {dimension_numbers = #tpu.dot_dimension_numbers<[1], [0], [0], [1], [0, 0, 1, 1], [], []>} : vector<64x128xbf16>, vector<128x128xbf16>, vector<64x128xf32> -> vector<64x128xf32>
    %c0_3 = arith.constant 0 : index
    %c0_4 = arith.constant 0 : index
    %3 = vector.load %arg3[%c0_3, %c0_4] : memref<64x128xf32, #tpu.memory_space<vmem>>, vector<64x128xf32>
    tpu.vector_store %arg3[%c0_3, %c0_4], %2 {strides = array<i32>} : memref<64x128xf32, #tpu.memory_space<vmem>>, vector<64x128xf32>,
    %c0_i32 = arith.constant 0 : i32
    %4 = arith.cmpi eq, %arg0, %c0_i32 : i32
    %5 = arith.extui %4 : i1 to i32
    %c0_i32_5 = arith.constant 0 : i32
    %6 = arith.cmpi ne, %5, %c0_i32_5 : i32
    scf.if %6 {
      %cst_16 = arith.constant 0.000000e+00 : f32
      %18 = vector.broadcast %cst_16 : f32 to vector<1x128xf32>
      %c0_17 = arith.constant 0 : index
      %c0_18 = arith.constant 0 : index
      %19 = vector.load %arg4[%c0_17, %c0_18] : memref<1x128xf32, #tpu.memory_space<vmem>>, vector<1x128xf32>
      tpu.vector_store %arg4[%c0_17, %c0_18], %18 {strides = array<i32>} : memref<1x128xf32, #tpu.memory_space<vmem>>, vector<1x128xf32>,
      %cst_19 = arith.constant 0.000000e+00 : f32
      %20 = vector.broadcast %cst_19 : f32 to vector<1x128xf32>
      %c0_20 = arith.constant 0 : index
      %c0_21 = arith.constant 0 : index
      %21 = vector.load %arg5[%c0_20, %c0_21] : memref<1x128xf32, #tpu.memory_space<vmem>>, vector<1x128xf32>
      tpu.vector_store %arg5[%c0_20, %c0_21], %20 {strides = array<i32>} : memref<1x128xf32, #tpu.memory_space<vmem>>, vector<1x128xf32>,
    } else {
    }
    %c0_6 = arith.constant 0 : index
    %c0_7 = arith.constant 0 : index
    %7 = vector.load %arg4[%c0_6, %c0_7] : memref<1x128xf32, #tpu.memory_space<vmem>>, vector<1x128xf32>
    %cst_8 = arith.constant dense<0.000000e+00> : vector<128xf32>
    %8 = vector.multi_reduction <add>, %2, %cst_8 [0] : vector<64x128xf32> to vector<128xf32>
    %9 = vector.shape_cast %8 : vector<128xf32> to vector<1x128xf32>
    %10 = arith.addf %7, %9 : vector<1x128xf32>
    %c0_9 = arith.constant 0 : index
    %c0_10 = arith.constant 0 : index
    %11 = vector.load %arg4[%c0_9, %c0_10] : memref<1x128xf32, #tpu.memory_space<vmem>>, vector<1x128xf32>
    tpu.vector_store %arg4[%c0_9, %c0_10], %10 {strides = array<i32>} : memref<1x128xf32, #tpu.memory_space<vmem>>, vector<1x128xf32>,
    %c0_11 = arith.constant 0 : index
    %c0_12 = arith.constant 0 : index
    %12 = vector.load %arg5[%c0_11, %c0_12] : memref<1x128xf32, #tpu.memory_space<vmem>>, vector<1x128xf32>
    %13 = arith.mulf %2, %2 : vector<64x128xf32>
    %cst_13 = arith.constant dense<0.000000e+00> : vector<128xf32>
    %14 = vector.multi_reduction <add>, %13, %cst_13 [0] : vector<64x128xf32> to vector<128xf32>
    %15 = vector.shape_cast %14 : vector<128xf32> to vector<1x128xf32>
    %16 = arith.addf %12, %15 : vector<1x128xf32>
    %c0_14 = arith.constant 0 : index
    %c0_15 = arith.constant 0 : index
    %17 = vector.load %arg5[%c0_14, %c0_15] : memref<1x128xf32, #tpu.memory_space<vmem>>, vector<1x128xf32>
    tpu.vector_store %arg5[%c0_14, %c0_15], %16 {strides = array<i32>} : memref<1x128xf32, #tpu.memory_space<vmem>>, vector<1x128xf32>,
    return
  }
  func.func @transform_0(%arg0: i32) -> (i32, i32) {
    %c0_i32 = arith.constant 0 : i32
    %c0_i32_0 = arith.constant 0 : i32
    return %arg0, %c0_i32 : i32, i32
  }
  func.func @transform_1(%arg0: i32) -> (i32, i32) {
    %c0_i32 = arith.constant 0 : i32
    %c0_i32_0 = arith.constant 0 : i32
    %c0_i32_1 = arith.constant 0 : i32
    return %c0_i32, %c0_i32_0 : i32, i32
  }
  func.func @transform_2(%arg0: i32) -> (i32, i32) {
    %c0_i32 = arith.constant 0 : i32
    %c0_i32_0 = arith.constant 0 : i32
    return %arg0, %c0_i32 : i32, i32
  }
  func.func @transform_3(%arg0: i32) -> (i32, i32) {
    %c0_i32 = arith.constant 0 : i32
    %c0_i32_0 = arith.constant 0 : i32
    %c0_i32_1 = arith.constant 0 : i32
    return %c0_i32, %c0_i32_0 : i32, i32
  }
  func.func @transform_4(%arg0: i32) -> (i32, i32) {
    %c0_i32 = arith.constant 0 : i32
    %c0_i32_0 = arith.constant 0 : i32
    %c0_i32_1 = arith.constant 0 : i32
    return %c0_i32, %c0_i32_0 : i32, i32
  }
}

module attributes {stable_mosaic.version = 11 : i64} {
  func.func @_bn_add_relu_kernel(%arg0: i32, %arg1: memref<64x128xf32, #tpu.memory_space<vmem>>, %arg2: memref<64x128xf32, #tpu.memory_space<vmem>>, %arg3: memref<1x128xf32, #tpu.memory_space<vmem>>, %arg4: memref<1x128xf32, #tpu.memory_space<vmem>>, %arg5: memref<1x128xf32, #tpu.memory_space<vmem>>, %arg6: memref<1x128xf32, #tpu.memory_space<vmem>>, %arg7: memref<64x128xf32, #tpu.memory_space<vmem>>) attributes {dimension_semantics = [#tpu.dimension_semantics<parallel>], iteration_bounds = array<i64: 2>, scalar_prefetch = 0 : i64, scratch_operands = 0 : i64, tpu.core_type = #tpu.core_type<tc>, window_params = [{transform_indices = @transform_0, window_bounds = array<i64: 64, 128>}, {transform_indices = @transform_1, window_bounds = array<i64: 64, 128>}, {pipeline_mode = #tpu.pipeline_mode<synchronous>, transform_indices = @transform_2, window_bounds = array<i64: 1, 128>}, {pipeline_mode = #tpu.pipeline_mode<synchronous>, transform_indices = @transform_3, window_bounds = array<i64: 1, 128>}, {pipeline_mode = #tpu.pipeline_mode<synchronous>, transform_indices = @transform_4, window_bounds = array<i64: 1, 128>}, {pipeline_mode = #tpu.pipeline_mode<synchronous>, transform_indices = @transform_5, window_bounds = array<i64: 1, 128>}, {transform_indices = @transform_6, window_bounds = array<i64: 64, 128>}]} {
    %c0 = arith.constant 0 : index
    %c0_0 = arith.constant 0 : index
    %0 = vector.load %arg1[%c0, %c0_0] : memref<64x128xf32, #tpu.memory_space<vmem>>, vector<64x128xf32>
    %c0_1 = arith.constant 0 : index
    %c0_2 = arith.constant 0 : index
    %1 = vector.load %arg3[%c0_1, %c0_2] : memref<1x128xf32, #tpu.memory_space<vmem>>, vector<1x128xf32>
    %2 = vector.broadcast %1 : vector<1x128xf32> to vector<64x128xf32>
    %3 = arith.mulf %0, %2 : vector<64x128xf32>
    %c0_3 = arith.constant 0 : index
    %c0_4 = arith.constant 0 : index
    %4 = vector.load %arg4[%c0_3, %c0_4] : memref<1x128xf32, #tpu.memory_space<vmem>>, vector<1x128xf32>
    %5 = vector.broadcast %4 : vector<1x128xf32> to vector<64x128xf32>
    %6 = arith.addf %3, %5 : vector<64x128xf32>
    %c0_5 = arith.constant 0 : index
    %c0_6 = arith.constant 0 : index
    %7 = vector.load %arg2[%c0_5, %c0_6] : memref<64x128xf32, #tpu.memory_space<vmem>>, vector<64x128xf32>
    %c0_7 = arith.constant 0 : index
    %c0_8 = arith.constant 0 : index
    %8 = vector.load %arg5[%c0_7, %c0_8] : memref<1x128xf32, #tpu.memory_space<vmem>>, vector<1x128xf32>
    %9 = vector.broadcast %8 : vector<1x128xf32> to vector<64x128xf32>
    %10 = arith.mulf %7, %9 : vector<64x128xf32>
    %c0_9 = arith.constant 0 : index
    %c0_10 = arith.constant 0 : index
    %11 = vector.load %arg6[%c0_9, %c0_10] : memref<1x128xf32, #tpu.memory_space<vmem>>, vector<1x128xf32>
    %12 = vector.broadcast %11 : vector<1x128xf32> to vector<64x128xf32>
    %13 = arith.addf %10, %12 : vector<64x128xf32>
    %14 = arith.addf %6, %13 : vector<64x128xf32>
    %cst = arith.constant 0.000000e+00 : f32
    %15 = vector.broadcast %cst : f32 to vector<64x128xf32>
    %16 = arith.maximumf %14, %15 : vector<64x128xf32>
    %c0_11 = arith.constant 0 : index
    %c0_12 = arith.constant 0 : index
    %17 = vector.load %arg7[%c0_11, %c0_12] : memref<64x128xf32, #tpu.memory_space<vmem>>, vector<64x128xf32>
    tpu.vector_store %arg7[%c0_11, %c0_12], %16 {strides = array<i32>} : memref<64x128xf32, #tpu.memory_space<vmem>>, vector<64x128xf32>,
    return
  }
  func.func @transform_0(%arg0: i32) -> (i32, i32) {
    %c0_i32 = arith.constant 0 : i32
    %c0_i32_0 = arith.constant 0 : i32
    return %arg0, %c0_i32 : i32, i32
  }
  func.func @transform_1(%arg0: i32) -> (i32, i32) {
    %c0_i32 = arith.constant 0 : i32
    %c0_i32_0 = arith.constant 0 : i32
    return %arg0, %c0_i32 : i32, i32
  }
  func.func @transform_2(%arg0: i32) -> (i32, i32) {
    %c0_i32 = arith.constant 0 : i32
    %c0_i32_0 = arith.constant 0 : i32
    %c0_i32_1 = arith.constant 0 : i32
    return %c0_i32, %c0_i32_0 : i32, i32
  }
  func.func @transform_3(%arg0: i32) -> (i32, i32) {
    %c0_i32 = arith.constant 0 : i32
    %c0_i32_0 = arith.constant 0 : i32
    %c0_i32_1 = arith.constant 0 : i32
    return %c0_i32, %c0_i32_0 : i32, i32
  }
  func.func @transform_4(%arg0: i32) -> (i32, i32) {
    %c0_i32 = arith.constant 0 : i32
    %c0_i32_0 = arith.constant 0 : i32
    %c0_i32_1 = arith.constant 0 : i32
    return %c0_i32, %c0_i32_0 : i32, i32
  }
  func.func @transform_5(%arg0: i32) -> (i32, i32) {
    %c0_i32 = arith.constant 0 : i32
    %c0_i32_0 = arith.constant 0 : i32
    %c0_i32_1 = arith.constant 0 : i32
    return %c0_i32, %c0_i32_0 : i32, i32
  }
  func.func @transform_6(%arg0: i32) -> (i32, i32) {
    %c0_i32 = arith.constant 0 : i32
    %c0_i32_0 = arith.constant 0 : i32
    return %arg0, %c0_i32 : i32, i32
  }
}

</mosaic_0001>

<bundles_post_ra>
// kernel: _lambda_.5
= control target key start
LH: loop header
LB: loop body
LE: loop exit
PB: predicated region body
PF: predicated region fallthrough
CT: control target
= control target key end

     0   :  { %s404_s12 = smov 0   ;;  %s431_s0 = inlined_call_operand.vmem [shape: f32[128,128], index: 0, kind: input, shape index: {}]   ;;  %s432_s1 = inlined_call_operand.vmem [shape: f32[1,128], index: 1, kind: input, shape index: {}]   ;;  %s433_s2 = inlined_call_operand.vmem [shape: f32[1,128], index: 2, kind: input, shape index: {}]   ;;  %s434_s3 = inlined_call_operand.vmem [shape: bf16[128,128], index: 3, kind: output, shape index: {}]  }
   0x1 LB: > { %s316_s13 = sadd.s32 4294967295, %s382_s12   ;;  %p320_p0 = scmp.ge.s32.totalorder %s382_s12, 1  ;;  %s382_s12 = sphi %s404_s12, %s13_s12  }
   0x2   : > { %p138_p1 = scmp.lt.s32.totalorder %s382_s12, 3 }
   0x4   : > { %p139_p2 = pnand %p320_p0, %p138_p1 }
   0x5   : > { %s321_s14 = sshll.u32 (!%p139_p2), %s316_s13, 3  ;;  %v325_v0 = vld [vmem:[%s432_s1] ss:$0 sm:$0xff] (!%p139_p2) }
   0x6   : > { %142 = sbr.rel (%p139_p2) target bundleno = 29 (0x1d), region = 32  ;;  %p163_p3 = scmp.lt.s32.totalorder (!%p139_p2), %s321_s14, 15  ;;  %v326_v1 = vld [vmem:[%s433_s2] ss:$0 sm:$0xff] (!%p139_p2) }
   0xd   : > { %s436_s14 = smov (!%p163_p3, %s321_s14), 15 }
   0xe   : > { %s322_s15 = sshll.u32 %s436_s14, 3  ;;  %s324_s23 = sshll.u32 %s436_s14, 2 }
   0xf   : > { %s166_s20 = scalar_lea.vmem %s431_s0, %s322_s15  ;;  %s172_s26 = scalar_lea.vmem %s434_s3, %s324_s23 }
  0x10   : > { %v174_v2 = vld [vmem:[%s166_s20] sm:$0xff]  ;;  %v175_v3 = vld [vmem:[%s166_s20 + $0x8] sm:$0xff]  ;;  %v176_v4 = vld [vmem:[%s166_s20 + $0x10] sm:$0xff] }
  0x11   : > { %v189_v5 = vmul.f32 %v325_v0, %v174_v2  ;;  %v190_v6 = vmul.f32 %v325_v0, %v175_v3  ;;  %v177_v7 = vld [vmem:[%s166_s20 + $0x18] sm:$0xff]  ;;  %v191_v8 = vmul.f32 %v325_v0, %v176_v4  ;;  %v178_v9 = vld [vmem:[%s166_s20 + $0x20] sm:$0xff]  ;;  %v179_v10 = vld [vmem:[%s166_s20 + $0x28] sm:$0xff] }
  0x12   : > { %v192_v11 = vmul.f32 %v325_v0, %v177_v7  ;;  %v193_v12 = vmul.f32 %v325_v0, %v178_v9  ;;  %v194_v13 = vmul.f32 %v325_v0, %v179_v10  ;;  %v180_v14 = vld [vmem:[%s166_s20 + $0x30] sm:$0xff]  ;;  %v181_v15 = vld [vmem:[%s166_s20 + $0x38] sm:$0xff] }
  0x13   : > { %v204_v16 = vadd.f32 %v326_v1, %v189_v5  ;;  %v205_v17 = vadd.f32 %v326_v1, %v190_v6  ;;  %v206_v18 = vadd.f32 %v326_v1, %v191_v8  ;;  %v195_v19 = vmul.f32 %v325_v0, %v180_v14 }
  0x14   : > { %v207_v20 = vadd.f32 %v326_v1, %v192_v11  ;;  %v208_v21 = vadd.f32 %v326_v1, %v193_v12  ;;  %v209_v22 = vadd.f32 %v326_v1, %v194_v13  ;;  %v196_v23 = vmul.f32 %v325_v0, %v181_v15 }
  0x15   : > { %v212_v24 = vmax.f32 %v204_v16, 0.0  ;;  %v213_v25 = vmax.f32 %v205_v17, 0.0  ;;  %v214_v26 = vmax.f32 %v206_v18, 0.0  ;;  %v210_v27 = vadd.f32 %v326_v1, %v195_v19 }
  0x16   : > { %v215_v28 = vmax.f32 %v207_v20, 0.0  ;;  %v216_v29 = vmax.f32 %v208_v21, 0.0  ;;  %v217_v30 = vmax.f32 %v209_v22, 0.0  ;;  %v211_v31 = vadd.f32 %v326_v1, %v196_v23 }
  0x17   : > { %v348_v32 = vpack.c.bf16 %v213_v25, %v212_v24  ;;  %v218_v33 = vmax.f32 %v210_v27, 0.0 }
  0x18   : > { %v353_v34 = vpack.c.bf16 %v215_v28, %v214_v26  ;;  %v358_v35 = vpack.c.bf16 %v217_v30, %v216_v29  ;;  %v219_v36 = vmax.f32 %v211_v31, 0.0 }
  0x19   : > { %349 = vst [vmem:[%s172_s26] sm:$0xff] %v348_v32  }
  0x1a   : > { %365 = vst [vmem:[%s172_s26 + $0x8] sm:$0xff] %v353_v34   ;;  %366 = vst [vmem:[%s172_s26 + $0x10] sm:$0xff] %v358_v35   ;;  %v363_v37 = vpack.c.bf16 %v219_v36, %v218_v33 }
  0x1c   : > { %367 = vst [vmem:[%s172_s26 + $0x18] sm:$0xff] %v363_v37  }
  0x1d PF: > { %s13_s12 = sadd.s32 1, %s382_s12  }
  0x1e   : > { %p10_p4 = scmp.ge.s32.totalorder %s13_s12, 4  }
  0x20   :  { %12 = sbr.rel (!%p10_p4) target bundleno = 1 (0x1), region = 62 }

// kernel: _lambda_.4
= control target key start
LH: loop header
LB: loop body
LE: loop exit
PB: predicated region body
PF: predicated region fallthrough
CT: control target
= control target key end

     0   :  { %s1117_s30 = smov 0   ;;  %s1264_s0 = inlined_call_operand.vmem [shape: bf16[128,128], index: 0, kind: input, shape index: {}]   ;;  %s1265_s1 = inlined_call_operand.vmem [shape: bf16[128,128], index: 1, kind: input, shape index: {}]   ;;  %s1266_s2 = inlined_call_operand.vmem [shape: bf16[128,128], index: 2, kind: input, shape index: {}]   ;;  %s1267_s3 = inlined_call_operand.vmem [shape: bf16[128,128], index: 3, kind: input, shape index: {}]   ;;  %s1268_s4 = inlined_call_operand.vmem [shape: f32[128,128], index: 4, kind: output, shape index: {0}]   ;;  %s1269_s5 = inlined_call_operand.vmem [shape: f32[128,128], index: 5, kind: output, shape index: {1}]   ;;  %s1270_s6 = inlined_call_operand.vmem [shape: f32[1,128], index: 6, kind: output, shape index: {2}]   ;;  %s1271_s7 = inlined_call_operand.vmem [shape: f32[1,128], index: 7, kind: output, shape index: {3}]   ;;  %s1272_s8 = inlined_call_operand.vmem [shape: f32[1,128], index: 8, kind: output, shape index: {4}]   ;;  %s1273_s9 = inlined_call_operand.vmem [shape: f32[1,128], index: 9, kind: output, shape index: {5}]  }
   0x1 LB: > { %s913_s10 = sadd.s32 4294967295, %s1064_s30   ;;  %p917_p0 = scmp.ge.s32.totalorder %s1064_s30, 1  ;;  %s1064_s30 = sphi %s1117_s30, %s20_s30  }
   0x2   : > { %p290_p1 = scmp.lt.s32.totalorder %s1064_s30, 3 }
   0x4   : > { %p291_p2 = pnand %p917_p0, %p290_p1 }
   0x5   : > { %v1034_v0 = vld [vmem:[%s1266_s2] sm:$0xff] (!%p291_p2)   ;;  %s918_s13 = sshll.u32 (!%p291_p2), %s913_s10, 3  ;;  %v1036_v2 = vld [vmem:[%s1266_s2 + $0x8] sm:$0xff] (!%p291_p2)   ;;  %v1038_v4 = vld [vmem:[%s1266_s2 + $0x10] sm:$0xff] (!%p291_p2)   ;;  %p950_p4 = scmp.ne.s32.totalorder (!%p291_p2), %s913_s10, 0 }
   0x6   : > { %294 = sbr.rel (%p291_p2) target bundleno = 295 (0x127), region = 36  ;;  %v1035_v1 = vld [vmem:[%s1267_s3] sm:$0xff] (!%p291_p2)   ;;  %977 = vmatprep.subr.bf16.mxu0 (!%p291_p2), %v1034_v0  ;;  %p337_p3 = scmp.lt.s32.totalorder (!%p291_p2), %s918_s13, 15  ;;  %v1037_v3 = vld [vmem:[%s1267_s3 + $0x8] sm:$0xff] (!%p291_p2)   ;;  %v1039_v5 = vld [vmem:[%s1267_s3 + $0x10] sm:$0xff] (!%p291_p2)  }
   0x7   : > { %1001 = vmatprep.subr.bf16.mxu1 (!%p291_p2), %v1035_v1  ;;  %978 = vmatpush3.bf16.msra.mxu0 (!%p291_p2), %v1034_v0  ;;  %v1040_v6 = vld [vmem:[%s1266_s2 + $0x18] sm:$0xff] (!%p291_p2)   ;;  %v1042_v8 = vld [vmem:[%s1266_s2 + $0x20] sm:$0xff] (!%p291_p2)   ;;  %v1044_v10 = vld [vmem:[%s1266_s2 + $0x28] sm:$0xff] (!%p291_p2)  }
   0x8   : > { %1002 = vmatpush3.bf16.msra.mxu1 (!%p291_p2), %v1035_v1  ;;  %979 = vmatprep.subr.bf16.mxu0 (!%p291_p2), %v1036_v2  ;;  %v1041_v7 = vld [vmem:[%s1267_s3 + $0x18] sm:$0xff] (!%p291_p2)   ;;  %v1043_v9 = vld [vmem:[%s1267_s3 + $0x20] sm:$0xff] (!%p291_p2)   ;;  %v1045_v11 = vld [vmem:[%s1267_s3 + $0x28] sm:$0xff] (!%p291_p2)  }
   0x9   : > { %1003 = vmatprep.subr.bf16.mxu1 (!%p291_p2), %v1037_v3  ;;  %v1046_v14 = vld [vmem:[%s1266_s2 + $0x30] sm:$0xff] (!%p291_p2)   ;;  %v1048_v16 = vld [vmem:[%s1266_s2 + $0x38] sm:$0xff] (!%p291_p2)  }
   0xa   : > { %v1047_v15 = vld [vmem:[%s1267_s3 + $0x30] sm:$0xff] (!%p291_p2)   ;;  %v1049_v17 = vld [vmem:[%s1267_s3 + $0x38] sm:$0xff] (!%p291_p2)  }
   0xb   : > { %980 = vmatpush3.bf16.msra.mxu0 (!%p291_p2), %v1036_v2 }
   0xc   : > { %1004 = vmatpush3.bf16.msra.mxu1 (!%p291_p2), %v1037_v3  ;;  %981 = vmatprep.subr.bf16.mxu0 (!%p291_p2), %v1038_v4 }
   0xd   : > { %s1275_s13 = smov (!%p337_p3, %s918_s13), 15  ;;  %1005 = vmatprep.subr.bf16.mxu1 %v1039_v5  ;;  %v1066_v40 = vmov (!%p950_p4), 0.0  }
   0xe   : > { %s919_s28 = sshll.u32 %s1275_s13, 2  ;;  %s923_s15 = sshll.u32 %s1275_s13, 3  ;;  %703 = vst [vmem:[%s1270_s6] sm:$0x1] (!%p950_p4), %v1066_v40  ;;  %704 = vst [vmem:[%s1271_s7] sm:$0x1] (!%p950_p4), %v1066_v40 }
   0xf   : > { %982 = vmatpush3.bf16.msra.mxu0 %v1038_v4  ;;  %s1163_s17 = scalar_lea.vmem %s1264_s0, %s919_s28  ;;  %s1171_s22 = scalar_lea.vmem %s1265_s1, %s919_s28  ;;  %705 = vst [vmem:[%s1272_s8] sm:$0x1] (!%p950_p4), %v1066_v40  ;;  %706 = vst [vmem:[%s1273_s9] sm:$0x1] (!%p950_p4), %v1066_v40 }
  0x10   : > { %1006 = vmatpush3.bf16.msra.mxu1 %v1039_v5  ;;  %983 = vmatprep.subr.bf16.mxu0 %v1040_v6  ;;  %v1050_v12 = vld [vmem:[%s1163_s17] sm:$0xff]   ;;  %v1052_v18 = vld [vmem:[%s1163_s17 + $0x8] sm:$0xff]   ;;  %v1054_v20 = vld [vmem:[%s1163_s17 + $0x10] sm:$0xff]   ;;  %s1200_s19 = scalar_lea.vmem %s1268_s4, %s923_s15  ;;  %s1205_s23 = scalar_lea.vmem %s1269_s5, %s923_s15 }
  0x11   : > { %1007 = vmatprep.subr.bf16.mxu1 %v1041_v7  ;;  %v1051_v13 = vld [vmem:[%s1171_s22] sm:$0xff]   ;;  %993 = vmatprep.mubr.bf16.mxu0 %v1050_v12  ;;  %v1053_v19 = vld [vmem:[%s1171_s22 + $0x8] sm:$0xff]   ;;  %v1055_v21 = vld [vmem:[%s1171_s22 + $0x10] sm:$0xff]  }
  0x12   : > { %1017 = vmatprep.mubr.bf16.mxu1 %v1051_v13  ;;  %v1056_v22 = vld [vmem:[%s1163_s17 + $0x18] sm:$0xff]  }
  0x13   : > { %984 = vmatpush3.bf16.msra.mxu0 %v1040_v6  ;;  %v1057_v23 = vld [vmem:[%s1171_s22 + $0x18] sm:$0xff]  }
  0x14   : > { %1008 = vmatpush3.bf16.msra.mxu1 %v1041_v7  ;;  %985 = vmatprep.subr.bf16.mxu0 %v1042_v8 }
  0x15   : > { %1009 = vmatprep.subr.bf16.mxu1 %v1043_v9 }
  0x17   : > { %986 = vmatpush3.bf16.msra.mxu0 %v1042_v8 }
  0x18   : > { %1010 = vmatpush3.bf16.msra.mxu1 %v1043_v9  ;;  %987 = vmatprep.subr.bf16.mxu0 %v1044_v10 }
  0x19   : > { %1011 = vmatprep.subr.bf16.mxu1 %v1045_v11 }
  0x1b   : > { %988 = vmatpush3.bf16.msra.mxu0 %v1044_v10 }
  0x1c   : > { %1012 = vmatpush3.bf16.msra.mxu1 %v1045_v11  ;;  %989 = vmatprep.subr.bf16.mxu0 %v1046_v14 }
  0x1d   : > { %1013 = vmatprep.subr.bf16.mxu1 %v1047_v15 }
  0x1f   : > { %990 = vmatpush3.bf16.msra.mxu0 %v1046_v14 }
  0x20   : > { %1014 = vmatpush3.bf16.msra.mxu1 %v1047_v15  ;;  %991 = vmatprep.subr.bf16.mxu0 %v1048_v16 }
  0x21   : > { %1015 = vmatprep.subr.bf16.mxu1 %v1049_v17 }
  0x23   : > { %992 = vmatpush3.bf16.msra.mxu0 %v1048_v16 }
  0x24   : > { %1016 = vmatpush3.bf16.msra.mxu1 %v1049_v17 }
  0x26   : > { %994 = vmatmul.mubr.bf16.vlgmr.msra.gmra.mrb[0].mxu0 %v1052_v18 }
  0x27   : > { %1018 = vmatmul.mubr.bf16.vlgmr.msra.gmra.mrb[0].mxu1 %v1053_v19  ;;  %997 = vmatprep.mubr.bf16.mxu0 %v1054_v20 }
  0x28   : > { %1021 = vmatprep.mubr.bf16.mxu1 %v1055_v21 }
  0x2e   : > { %998 = vmatmul.mubr.bf16.gmra.mrb[4].mxu0 %v1056_v22 }
  0x2f   : > { %1022 = vmatmul.mubr.bf16.gmra.mrb[4].mxu1 %v1057_v23 }
  0xf9   : > { %v995_v24 = vpop.f32.mrb[0].mxu0 }
  0xfa   : > { %685 = vst [vmem:[%s1200_s19 + $0x10] sm:$0xff] %v995_v24  ;;  %v1019_v25 = vpop.f32.mrb[0].mxu1  ;;  %v491_v26 = vpop.f32.mrb[1].mxu0 }
  0xfb   : > { %693 = vst [vmem:[%s1205_s23 + $0x10] sm:$0xff] %v1019_v25  ;;  %683 = vst [vmem:[%s1200_s19] sm:$0xff] %v491_v26  ;;  %v652_v27 = vpop.f32.mrb[1].mxu1  ;;  %v996_v28 = vpop.f32.mrb[2].mxu0 }
  0xfc   : > { %691 = vst [vmem:[%s1205_s23] sm:$0xff] %v652_v27  ;;  %686 = vst [vmem:[%s1200_s19 + $0x18] sm:$0xff] %v996_v28  ;;  %v1020_v29 = vpop.f32.mrb[2].mxu1  ;;  %v494_v30 = vpop.f32.mrb[3].mxu0 }
  0xfd   : > { %694 = vst [vmem:[%s1205_s23 + $0x18] sm:$0xff] %v1020_v29  ;;  %684 = vst [vmem:[%s1200_s19 + $0x8] sm:$0xff] %v494_v30  ;;  %v655_v31 = vpop.f32.mrb[3].mxu1 }
  0xfe   : > { %692 = vst [vmem:[%s1205_s23 + $0x8] sm:$0xff] %v655_v31 }
 0x100   : > { %702 = sbr.rel (%p950_p4) target bundleno = 263 (0x107), region = 40 }
 0x101   : > { %v999_v32 = vpop.f32.mrb[4].mxu0 }
 0x102   : > { %689 = vst [vmem:[%s1200_s19 + $0x30] sm:$0xff] %v999_v32  ;;  %v1023_v33 = vpop.f32.mrb[4].mxu1  ;;  %v507_v34 = vpop.f32.mrb[5].mxu0 }
 0x103   : > { %697 = vst [vmem:[%s1205_s23 + $0x30] sm:$0xff] %v1023_v33  ;;  %687 = vst [vmem:[%s1200_s19 + $0x20] sm:$0xff] %v507_v34  ;;  %v668_v35 = vpop.f32.mrb[5].mxu1  ;;  %v1000_v36 = vpop.f32.mrb[6].mxu0 }
 0x104   : > { %695 = vst [vmem:[%s1205_s23 + $0x20] sm:$0xff] %v668_v35  ;;  %690 = vst [vmem:[%s1200_s19 + $0x38] sm:$0xff] %v1000_v36  ;;  %v1024_v37 = vpop.f32.mrb[6].mxu1  ;;  %v510_v38 = vpop.f32.mrb[7].mxu0 }
 0x105   : > { %698 = vst [vmem:[%s1205_s23 + $0x38] sm:$0xff] %v1024_v37  ;;  %688 = vst [vmem:[%s1200_s19 + $0x28] sm:$0xff] %v510_v38  ;;  %v671_v39 = vpop.f32.mrb[7].mxu1 }
 0x106   : > { %696 = vst [vmem:[%s1205_s23 + $0x28] sm:$0xff] %v671_v39 }
 0x107 PF: > { %v708_v41 = vadd.f32 %v494_v30, %v491_v26  ;;  %v724_v42 = vmul.f32 %v491_v26, %v491_v26  ;;  %v725_v43 = vmul.f32 %v494_v30, %v494_v30  ;;  %v726_v44 = vmul.f32 %v995_v24, %v995_v24 }
 0x108   : > { %v727_v46 = vmul.f32 %v996_v28, %v996_v28  ;;  %v748_v48 = vadd.f32 %v655_v31, %v652_v27  ;;  %v764_v49 = vmul.f32 %v652_v27, %v652_v27  ;;  %v765_v50 = vmul.f32 %v655_v31, %v655_v31 }
 0x109   : > { %v709_v45 = vadd.f32 %v995_v24, %v708_v41  ;;  %v732_v47 = vadd.f32 %v725_v43, %v724_v42  ;;  %v766_v51 = vmul.f32 %v1019_v25, %v1019_v25  ;;  %v728_v53 = vmul.f32 %v507_v34, %v507_v34  ;;  %v723_v41 = vld [vmem:[%s1271_s7] sm:$0x1] }
 0x10a   : > { %v749_v55 = vadd.f32 %v1019_v25, %v748_v48  ;;  %v767_v56 = vmul.f32 %v1020_v29, %v1020_v29  ;;  %v772_v57 = vadd.f32 %v765_v50, %v764_v49  ;;  %v729_v59 = vmul.f32 %v510_v38, %v510_v38  ;;  %v747_v42 = vld [vmem:[%s1272_s8] sm:$0x1] }
 0x10b   : > { %v710_v52 = vadd.f32 %v996_v28, %v709_v45  ;;  %v733_v54 = vadd.f32 %v732_v47, %v726_v44  ;;  %v768_v62 = vmul.f32 %v668_v35, %v668_v35  ;;  %v730_v1 = vmul.f32 %v999_v32, %v999_v32  ;;  %v763_v50 = vld [vmem:[%s1273_s9] sm:$0x1] }
 0x10c   : > { %v750_v61 = vadd.f32 %v1020_v29, %v749_v55  ;;  %v773_v63 = vadd.f32 %v772_v57, %v766_v51  ;;  %v769_v4 = vmul.f32 %v671_v39, %v671_v39  ;;  %v731_v7 = vmul.f32 %v1000_v36, %v1000_v36 }
 0x10d   : > { %v711_v58 = vadd.f32 %v710_v52, %v507_v34  ;;  %v734_v60 = vadd.f32 %v733_v54, %v727_v46  ;;  %v770_v10 = vmul.f32 %v1023_v33, %v1023_v33  ;;  %v771_v15 = vmul.f32 %v1024_v37, %v1024_v37 }
 0x10e   : > { %v751_v3 = vadd.f32 %v750_v61, %v668_v35  ;;  %v774_v5 = vadd.f32 %v773_v63, %v767_v56 }
 0x10f   : > { %v712_v0 = vadd.f32 %v711_v58, %v510_v38  ;;  %v735_v2 = vadd.f32 %v734_v60, %v728_v53 }
 0x110   : > { %v752_v9 = vadd.f32 %v751_v3, %v671_v39  ;;  %v775_v11 = vadd.f32 %v774_v5, %v768_v62 }
 0x111   : > { %v713_v6 = vadd.f32 %v999_v32, %v712_v0  ;;  %v736_v8 = vadd.f32 %v735_v2, %v729_v59 }
 0x112   : > { %v753_v14 = vadd.f32 %v1023_v33, %v752_v9  ;;  %v776_v16 = vadd.f32 %v775_v11, %v769_v4 }
 0x113   : > { %v714_v12 = vadd.f32 %v1000_v36, %v713_v6  ;;  %v737_v13 = vadd.f32 %v736_v8, %v730_v1  ;;  %v707_v36 = vld [vmem:[%s1270_s6] sm:$0x1] }
 0x114   : > { %v754_v19 = vadd.f32 %v1024_v37, %v753_v14  ;;  %v777_v20 = vadd.f32 %v776_v16, %v770_v10 }
 0x115   : > { %v715_v17 = vrot.slane %v714_v12, 4  ;;  %v738_v18 = vadd.f32 %v737_v13, %v731_v7 }
 0x116   : > { %v755_v23 = vrot.slane %v754_v19, 4  ;;  %v778_v24 = vadd.f32 %v777_v20, %v771_v15 }
 0x117   : > { %v716_v21 = vadd.f32 %v715_v17, %v714_v12  ;;  %v739_v22 = vrot.slane %v738_v18, 4 }
 0x118   : > { %v756_v27 = vadd.f32 %v755_v23, %v754_v19  ;;  %v779_v28 = vrot.slane %v778_v24, 4 }
 0x119   : > { %v717_v25 = vrot.slane %v716_v21, 2  ;;  %v740_v26 = vadd.f32 %v739_v22, %v738_v18 }
 0x11a   : > { %v757_v31 = vrot.slane %v756_v27, 2  ;;  %v780_v32 = vadd.f32 %v779_v28, %v778_v24 }
 0x11b   : > { %v718_v29 = vadd.f32 %v717_v25, %v716_v21  ;;  %v741_v30 = vrot.slane %v740_v26, 2 }
 0x11c   : > { %v758_v35 = vadd.f32 %v757_v31, %v756_v27  ;;  %v781_v37 = vrot.slane %v780_v32, 2 }
 0x11d   : > { %v719_v34 = vrot.slane %v718_v29, 1  ;;  %v742_v33 = vadd.f32 %v741_v30, %v740_v26 }
 0x11e   : > { %v759_v40 = vrot.slane %v758_v35, 1  ;;  %v782_v43 = vadd.f32 %v781_v37, %v780_v32 }
 0x11f   : > { %v720_v38 = vadd.f32 %v719_v34, %v718_v29  ;;  %v743_v39 = vrot.slane %v742_v33, 1 }
 0x120   : > { %v760_v46 = vadd.f32 %v759_v40, %v758_v35  ;;  %v783_v47 = vrot.slane %v782_v43, 1 }
 0x121   : > { %v721_v44 = vadd.f32 %v720_v38, %v707_v36  ;;  %v744_v45 = vadd.f32 %v743_v39, %v742_v33 }
 0x122   : > { %v761_v49 = vadd.f32 %v760_v46, %v747_v42  ;;  %v784_v51 = vadd.f32 %v783_v47, %v782_v43 }
 0x123   : > { %722 = vst [vmem:[%s1270_s6] sm:$0x1] %v721_v44  ;;  %v745_v48 = vadd.f32 %v744_v45, %v723_v41 }
 0x124   : > { %762 = vst [vmem:[%s1272_s8] sm:$0x1] %v761_v49  ;;  %v785_v52 = vadd.f32 %v784_v51, %v763_v50 }
 0x125   : > { %746 = vst [vmem:[%s1271_s7] sm:$0x1] %v745_v48 }
 0x126   : > { %786 = vst [vmem:[%s1273_s9] sm:$0x1] %v785_v52 }
 0x127 PF: > { %s20_s30 = sadd.s32 1, %s1064_s30  }
 0x128   : > { %p17_p5 = scmp.ge.s32.totalorder %s20_s30, 4  }
 0x12a   :  { %19 = sbr.rel (!%p17_p5) target bundleno = 1 (0x1), region = 117 }

// kernel: _lambda_.6
= control target key start
LH: loop header
LB: loop body
LE: loop exit
PB: predicated region body
PF: predicated region fallthrough
CT: control target
= control target key end

     0   :  { %s611_s15 = smov 0   ;;  %s684_s0 = inlined_call_operand.vmem [shape: bf16[128,128], index: 0, kind: input, shape index: {}]   ;;  %s685_s1 = inlined_call_operand.vmem [shape: bf16[128,128], index: 1, kind: input, shape index: {}]   ;;  %s686_s2 = inlined_call_operand.vmem [shape: f32[128,128], index: 2, kind: output, shape index: {0}]   ;;  %s687_s3 = inlined_call_operand.vmem [shape: f32[1,128], index: 3, kind: output, shape index: {1}]   ;;  %s688_s4 = inlined_call_operand.vmem [shape: f32[1,128], index: 4, kind: output, shape index: {2}]  }
   0x1 LB: > { %s480_s16 = sadd.s32 4294967295, %s583_s15   ;;  %p484_p0 = scmp.ge.s32.totalorder %s583_s15, 1  ;;  %s583_s15 = sphi %s611_s15, %s15_s15  }
   0x2   : > { %p158_p1 = scmp.lt.s32.totalorder %s583_s15, 3 }
   0x4   : > { %p159_p2 = pnand %p484_p0, %p158_p1 }
   0x5   : > { %v565_v0 = vld [vmem:[%s685_s1] sm:$0xff] (!%p159_p2)   ;;  %s485_s19 = sshll.u32 (!%p159_p2), %s480_s16, 3  ;;  %v566_v1 = vld [vmem:[%s685_s1 + $0x8] sm:$0xff] (!%p159_p2)   ;;  %v567_v2 = vld [vmem:[%s685_s1 + $0x10] sm:$0xff] (!%p159_p2)   ;;  %p501_p4 = scmp.ne.s32.totalorder (!%p159_p2), %s480_s16, 0 }
   0x6   : > { %162 = sbr.rel (%p159_p2) target bundleno = 285 (0x11d), region = 28  ;;  %p185_p3 = scmp.lt.s32.totalorder (!%p159_p2), %s485_s19, 15  ;;  %516 = vmatprep.subr.bf16.mxu0 (!%p159_p2), %v565_v0  ;;  %540 = vmatprep.subr.bf16.mxu1 (!%p159_p2), %v565_v0  ;;  %v568_v3 = vld [vmem:[%s685_s1 + $0x18] sm:$0xff] (!%p159_p2)   ;;  %v569_v6 = vld [vmem:[%s685_s1 + $0x20] sm:$0xff] (!%p159_p2)   ;;  %v570_v7 = vld [vmem:[%s685_s1 + $0x28] sm:$0xff] (!%p159_p2)  }
   0x7   : > { %517 = vmatpush3.bf16.msra.mxu0 (!%p159_p2), %v565_v0  ;;  %548 = vmatpush3.bf16.msra.mxu1 (!%p159_p2), %v565_v0  ;;  %v571_v8 = vld [vmem:[%s685_s1 + $0x30] sm:$0xff] (!%p159_p2)   ;;  %v572_v9 = vld [vmem:[%s685_s1 + $0x38] sm:$0xff] (!%p159_p2)  }
   0x8   : > { %518 = vmatprep.subr.bf16.mxu0 (!%p159_p2), %v566_v1  ;;  %541 = vmatprep.subr.bf16.mxu1 (!%p159_p2), %v566_v1 }
   0xb   : > { %519 = vmatpush3.bf16.msra.mxu0 (!%p159_p2), %v566_v1  ;;  %549 = vmatpush3.bf16.msra.mxu1 (!%p159_p2), %v566_v1 }
   0xc   : > { %520 = vmatprep.subr.bf16.mxu0 (!%p159_p2), %v567_v2  ;;  %542 = vmatprep.subr.bf16.mxu1 (!%p159_p2), %v567_v2 }
   0xd   : > { %s690_s19 = smov (!%p185_p3, %s485_s19), 15  ;;  %v585_v20 = vmov (!%p501_p4), 0.0  }
   0xe   : > { %s486_s24 = sshll.u32 %s690_s19, 2  ;;  %s488_s12 = sshll.u32 %s690_s19, 3  ;;  %370 = vst [vmem:[%s687_s3] sm:$0x1] (!%p501_p4), %v585_v20  ;;  %371 = vst [vmem:[%s688_s4] sm:$0x1] (!%p501_p4), %v585_v20 }
   0xf   : > { %s636_s27 = scalar_lea.vmem %s684_s0, %s486_s24  ;;  %521 = vmatpush3.bf16.msra.mxu0 %v567_v2  ;;  %550 = vmatpush3.bf16.msra.mxu1 %v567_v2  ;;  %s194_s17 = scalar_lea.vmem %s686_s2, %s488_s12 }
  0x10   : > { %v573_v4 = vld [vmem:[%s636_s27] sm:$0xff]   ;;  %v574_v5 = vld [vmem:[%s636_s27 + $0x10] sm:$0xff]   ;;  %522 = vmatprep.subr.bf16.mxu0 %v568_v3  ;;  %543 = vmatprep.subr.bf16.mxu1 %v568_v3  ;;  %v575_v10 = vld [vmem:[%s636_s27 + $0x8] sm:$0xff]  }
  0x11   : > { %532 = vmatprep.mubr.bf16.mxu0 %v573_v4  ;;  %536 = vmatprep.mubr.bf16.mxu1 %v574_v5  ;;  %v576_v11 = vld [vmem:[%s636_s27 + $0x18] sm:$0xff]  }
  0x13   : > { %523 = vmatpush3.bf16.msra.mxu0 %v568_v3  ;;  %551 = vmatpush3.bf16.msra.mxu1 %v568_v3 }
  0x14   : > { %524 = vmatprep.subr.bf16.mxu0 %v569_v6  ;;  %544 = vmatprep.subr.bf16.mxu1 %v569_v6 }
  0x17   : > { %525 = vmatpush3.bf16.msra.mxu0 %v569_v6  ;;  %552 = vmatpush3.bf16.msra.mxu1 %v569_v6 }
  0x18   : > { %526 = vmatprep.subr.bf16.mxu0 %v570_v7  ;;  %545 = vmatprep.subr.bf16.mxu1 %v570_v7 }
  0x1b   : > { %527 = vmatpush3.bf16.msra.mxu0 %v570_v7  ;;  %553 = vmatpush3.bf16.msra.mxu1 %v570_v7 }
  0x1c   : > { %528 = vmatprep.subr.bf16.mxu0 %v571_v8  ;;  %546 = vmatprep.subr.bf16.mxu1 %v571_v8 }
  0x1f   : > { %529 = vmatpush3.bf16.msra.mxu0 %v571_v8  ;;  %554 = vmatpush3.bf16.msra.mxu1 %v571_v8 }
  0x20   : > { %530 = vmatprep.subr.bf16.mxu0 %v572_v9  ;;  %547 = vmatprep.subr.bf16.mxu1 %v572_v9 }
  0x23   : > { %531 = vmatpush3.bf16.msra.mxu0 %v572_v9  ;;  %555 = vmatpush3.bf16.msra.mxu1 %v572_v9 }
  0x26   : > { %533 = vmatmul.mubr.bf16.vlgmr.msra.gmra.mrb[0].mxu0 %v575_v10  ;;  %537 = vmatmul.mubr.bf16.vlgmr.msra.gmra.mrb[0].mxu1 %v576_v11 }
  0xf7   : > { %369 = sbr.rel (%p501_p4) target bundleno = 254 (0xfe), region = 32 }
  0xf9   : > { %v534_v12 = vpop.f32.mrb[0].mxu0  ;;  %v538_v13 = vpop.f32.mrb[0].mxu1 }
  0xfa   : > { %360 = vst [vmem:[%s194_s17 + $0x10] sm:$0xff] %v534_v12  ;;  %364 = vst [vmem:[%s194_s17 + $0x30] sm:$0xff] %v538_v13  ;;  %v327_v14 = vpop.f32.mrb[1].mxu0  ;;  %v343_v15 = vpop.f32.mrb[1].mxu1 }
  0xfb   : > { %358 = vst [vmem:[%s194_s17] sm:$0xff] %v327_v14  ;;  %362 = vst [vmem:[%s194_s17 + $0x20] sm:$0xff] %v343_v15  ;;  %v535_v16 = vpop.f32.mrb[2].mxu0  ;;  %v539_v17 = vpop.f32.mrb[2].mxu1 }
  0xfc   : > { %361 = vst [vmem:[%s194_s17 + $0x18] sm:$0xff] %v535_v16  ;;  %365 = vst [vmem:[%s194_s17 + $0x38] sm:$0xff] %v539_v17  ;;  %v330_v18 = vpop.f32.mrb[3].mxu0  ;;  %v346_v19 = vpop.f32.mrb[3].mxu1 }
  0xfd   : > { %359 = vst [vmem:[%s194_s17 + $0x8] sm:$0xff] %v330_v18  ;;  %363 = vst [vmem:[%s194_s17 + $0x28] sm:$0xff] %v346_v19 }
  0xfe PF: > { %v373_v21 = vadd.f32 %v330_v18, %v327_v14  ;;  %v389_v22 = vmul.f32 %v327_v14, %v327_v14  ;;  %v390_v23 = vmul.f32 %v330_v18, %v330_v18  ;;  %v391_v24 = vmul.f32 %v534_v12, %v534_v12  ;;  %v372_v52 = vld [vmem:[%s687_s3] sm:$0x1] }
  0xff   : > { %v392_v26 = vmul.f32 %v535_v16, %v535_v16  ;;  %v393_v29 = vmul.f32 %v343_v15, %v343_v15  ;;  %v394_v32 = vmul.f32 %v346_v19, %v346_v19  ;;  %v395_v35 = vmul.f32 %v538_v13, %v538_v13  ;;  %v388_v55 = vld [vmem:[%s688_s4] sm:$0x1] }
 0x100   : > { %v374_v25 = vadd.f32 %v534_v12, %v373_v21  ;;  %v397_v27 = vadd.f32 %v390_v23, %v389_v22  ;;  %v396_v38 = vmul.f32 %v539_v17, %v539_v17 }
 0x102   : > { %v375_v28 = vadd.f32 %v535_v16, %v374_v25  ;;  %v398_v30 = vadd.f32 %v397_v27, %v391_v24 }
 0x104   : > { %v376_v31 = vadd.f32 %v375_v28, %v343_v15  ;;  %v399_v33 = vadd.f32 %v398_v30, %v392_v26 }
 0x106   : > { %v377_v34 = vadd.f32 %v376_v31, %v346_v19  ;;  %v400_v36 = vadd.f32 %v399_v33, %v393_v29 }
 0x108   : > { %v378_v37 = vadd.f32 %v538_v13, %v377_v34  ;;  %v401_v39 = vadd.f32 %v400_v36, %v394_v32 }
 0x10a   : > { %v379_v40 = vadd.f32 %v539_v17, %v378_v37  ;;  %v402_v41 = vadd.f32 %v401_v39, %v395_v35 }
 0x10c   : > { %v380_v42 = vrot.slane %v379_v40, 4  ;;  %v403_v43 = vadd.f32 %v402_v41, %v396_v38 }
 0x10e   : > { %v381_v44 = vadd.f32 %v380_v42, %v379_v40  ;;  %v404_v45 = vrot.slane %v403_v43, 4 }
 0x110   : > { %v382_v46 = vrot.slane %v381_v44, 2  ;;  %v405_v47 = vadd.f32 %v404_v45, %v403_v43 }
 0x112   : > { %v383_v48 = vadd.f32 %v382_v46, %v381_v44  ;;  %v406_v49 = vrot.slane %v405_v47, 2 }
 0x114   : > { %v384_v50 = vrot.slane %v383_v48, 1  ;;  %v407_v51 = vadd.f32 %v406_v49, %v405_v47 }
 0x116   : > { %v385_v53 = vadd.f32 %v384_v50, %v383_v48  ;;  %v408_v54 = vrot.slane %v407_v51, 1 }
 0x118   : > { %v386_v56 = vadd.f32 %v385_v53, %v372_v52  ;;  %v409_v57 = vadd.f32 %v408_v54, %v407_v51 }
 0x11a   : > { %387 = vst [vmem:[%s687_s3] sm:$0x1] %v386_v56  ;;  %v410_v58 = vadd.f32 %v409_v57, %v388_v55 }
 0x11c   : > { %411 = vst [vmem:[%s688_s4] sm:$0x1] %v410_v58 }
 0x11d PF: > { %s15_s15 = sadd.s32 1, %s583_s15  }
 0x11e   : > { %p12_p5 = scmp.ge.s32.totalorder %s15_s15, 4  }
 0x120   :  { %14 = sbr.rel (!%p12_p5) target bundleno = 1 (0x1), region = 78 }

// kernel: _lambda_.7
= control target key start
LH: loop header
LB: loop body
LE: loop exit
PB: predicated region body
PF: predicated region fallthrough
CT: control target
= control target key end

     0   :  { %s513_s21 = smov 0   ;;  %s600_s0 = inlined_call_operand.vmem [shape: f32[128,128], index: 0, kind: input, shape index: {}]   ;;  %s601_s1 = inlined_call_operand.vmem [shape: f32[128,128], index: 1, kind: input, shape index: {}]   ;;  %s602_s2 = inlined_call_operand.vmem [shape: f32[1,128], index: 2, kind: input, shape index: {}]   ;;  %s603_s3 = inlined_call_operand.vmem [shape: f32[1,128], index: 3, kind: input, shape index: {}]   ;;  %s604_s4 = inlined_call_operand.vmem [shape: f32[1,128], index: 4, kind: input, shape index: {}]   ;;  %s605_s5 = inlined_call_operand.vmem [shape: f32[1,128], index: 5, kind: input, shape index: {}]   ;;  %s606_s6 = inlined_call_operand.vmem [shape: f32[128,128], index: 6, kind: output, shape index: {}]  }
   0x1 LB: > { %s445_s22 = sadd.s32 4294967295, %s476_s21   ;;  %p449_p0 = scmp.ge.s32.totalorder %s476_s21, 1  ;;  %s476_s21 = sphi %s513_s21, %s16_s21  }
   0x2   : > { %p224_p1 = scmp.lt.s32.totalorder %s476_s21, 3 }
   0x4   : > { %p225_p2 = pnand %p449_p0, %p224_p1 }
   0x5   : > { %s450_s23 = sshll.u32 (!%p225_p2), %s445_s22, 3  ;;  %v456_v0 = vld [vmem:[%s602_s2] ss:$0 sm:$0xff] (!%p225_p2) }
   0x6   : > { %228 = sbr.rel (%p225_p2) target bundleno = 35 (0x23), region = 44  ;;  %p260_p3 = scmp.lt.s32.totalorder (!%p225_p2), %s450_s23, 15  ;;  %v458_v1 = vld [vmem:[%s604_s4] ss:$0 sm:$0xff] (!%p225_p2) }
   0x7   : > { %v544_v2 = vld [vmem:[%s603_s3] ss:$0 sm:$0xff] (!%p225_p2) }
   0x8   : > { %v549_v3 = vld [vmem:[%s605_s5] ss:$0 sm:$0xff] (!%p225_p2) }
   0xd   : > { %s608_s23 = smov (!%p260_p3, %s450_s23), 15 }
   0xe   : > { %s521_s24 = sshll.u32 %s608_s23, 3 }
   0xf   : > { %s533_s7 = scalar_lea.vmem %s600_s0, %s521_s24  ;;  %s539_s10 = scalar_lea.vmem %s601_s1, %s521_s24 }
  0x10   : > { %v277_v4 = vld [vmem:[%s533_s7] sm:$0xff]  ;;  %v278_v6 = vld [vmem:[%s533_s7 + $0x8] sm:$0xff]  ;;  %v279_v11 = vld [vmem:[%s533_s7 + $0x10] sm:$0xff]  ;;  %s574_s17 = scalar_lea.vmem %s606_s6, %s521_s24 }
  0x11   : > { %v315_v5 = vld [vmem:[%s539_s10] sm:$0xff]  ;;  %v292_v7 = vmul.f32 %v456_v0, %v277_v4  ;;  %v293_v9 = vmul.f32 %v456_v0, %v278_v6  ;;  %v316_v10 = vld [vmem:[%s539_s10 + $0x8] sm:$0xff]  ;;  %v317_v12 = vld [vmem:[%s539_s10 + $0x10] sm:$0xff]  ;;  %v294_v14 = vmul.f32 %v456_v0, %v279_v11 }
  0x12   : > { %v330_v8 = vmul.f32 %v458_v1, %v315_v5  ;;  %v331_v13 = vmul.f32 %v458_v1, %v316_v10  ;;  %v332_v15 = vmul.f32 %v458_v1, %v317_v12  ;;  %v280_v16 = vld [vmem:[%s533_s7 + $0x18] sm:$0xff]  ;;  %v281_v18 = vld [vmem:[%s533_s7 + $0x20] sm:$0xff]  ;;  %v282_v24 = vld [vmem:[%s533_s7 + $0x28] sm:$0xff] }
  0x13   : > { %v318_v17 = vld [vmem:[%s539_s10 + $0x18] sm:$0xff]  ;;  %v307_v19 = vadd.f32 %v544_v2, %v292_v7  ;;  %v308_v21 = vadd.f32 %v544_v2, %v293_v9  ;;  %v295_v22 = vmul.f32 %v456_v0, %v280_v16  ;;  %v319_v23 = vld [vmem:[%s539_s10 + $0x20] sm:$0xff]  ;;  %v309_v26 = vadd.f32 %v544_v2, %v294_v14  ;;  %v320_v29 = vld [vmem:[%s539_s10 + $0x28] sm:$0xff] }
  0x14   : > { %v345_v20 = vadd.f32 %v549_v3, %v330_v8  ;;  %v346_v25 = vadd.f32 %v549_v3, %v331_v13  ;;  %v347_v27 = vadd.f32 %v549_v3, %v332_v15  ;;  %v333_v28 = vmul.f32 %v458_v1, %v318_v17  ;;  %v283_v38 = vld [vmem:[%s533_s7 + $0x30] sm:$0xff]  ;;  %v284_v44 = vld [vmem:[%s533_s7 + $0x38] sm:$0xff] }
  0x15   : > { %v310_v31 = vadd.f32 %v544_v2, %v295_v22  ;;  %v296_v32 = vmul.f32 %v456_v0, %v281_v18  ;;  %v334_v33 = vmul.f32 %v458_v1, %v319_v23  ;;  %v297_v37 = vmul.f32 %v456_v0, %v282_v24  ;;  %v321_v39 = vld [vmem:[%s539_s10 + $0x30] sm:$0xff]  ;;  %v322_v45 = vld [vmem:[%s539_s10 + $0x38] sm:$0xff] }
  0x16   : > { %v353_v30 = vadd.f32 %v345_v20, %v307_v19  ;;  %v354_v34 = vadd.f32 %v346_v25, %v308_v21  ;;  %v355_v35 = vadd.f32 %v347_v27, %v309_v26  ;;  %v348_v36 = vadd.f32 %v549_v3, %v333_v28 }
  0x17   : > { %v311_v41 = vadd.f32 %v544_v2, %v296_v32  ;;  %v349_v42 = vadd.f32 %v549_v3, %v334_v33  ;;  %v335_v43 = vmul.f32 %v458_v1, %v320_v29  ;;  %v312_v49 = vadd.f32 %v544_v2, %v297_v37 }
  0x18   : > { %v361_v40 = vmax.f32 %v353_v30, 0.0  ;;  %v362_v46 = vmax.f32 %v354_v34, 0.0  ;;  %v363_v47 = vmax.f32 %v355_v35, 0.0  ;;  %v356_v48 = vadd.f32 %v348_v36, %v310_v31 }
  0x19   : > { %v357_v50 = vadd.f32 %v349_v42, %v311_v41  ;;  %v350_v51 = vadd.f32 %v549_v3, %v335_v43  ;;  %v298_v52 = vmul.f32 %v456_v0, %v283_v38  ;;  %v336_v53 = vmul.f32 %v458_v1, %v321_v39 }
  0x1a   : > { %369 = vst [vmem:[%s574_s17] sm:$0xff] %v361_v40  ;;  %370 = vst [vmem:[%s574_s17 + $0x8] sm:$0xff] %v362_v46  ;;  %v364_v54 = vmax.f32 %v356_v48, 0.0  ;;  %v299_v55 = vmul.f32 %v456_v0, %v284_v44  ;;  %v337_v56 = vmul.f32 %v458_v1, %v322_v45 }
  0x1b   : > { %371 = vst [vmem:[%s574_s17 + $0x10] sm:$0xff] %v363_v47  ;;  %v365_v57 = vmax.f32 %v357_v50, 0.0  ;;  %v358_v58 = vadd.f32 %v350_v51, %v312_v49  ;;  %v313_v59 = vadd.f32 %v544_v2, %v298_v52  ;;  %v351_v60 = vadd.f32 %v549_v3, %v336_v53 }
  0x1c   : > { %372 = vst [vmem:[%s574_s17 + $0x18] sm:$0xff] %v364_v54  ;;  %v314_v61 = vadd.f32 %v544_v2, %v299_v55  ;;  %v352_v62 = vadd.f32 %v549_v3, %v337_v56 }
  0x1d   : > { %373 = vst [vmem:[%s574_s17 + $0x20] sm:$0xff] %v365_v57  ;;  %v366_v63 = vmax.f32 %v358_v58, 0.0  ;;  %v359_v4 = vadd.f32 %v351_v60, %v313_v59 }
  0x1e   : > { %v360_v5 = vadd.f32 %v352_v62, %v314_v61 }
  0x1f   : > { %374 = vst [vmem:[%s574_s17 + $0x28] sm:$0xff] %v366_v63  ;;  %v367_v0 = vmax.f32 %v359_v4, 0.0 }
  0x20   : > { %v368_v6 = vmax.f32 %v360_v5, 0.0 }
  0x21   : > { %375 = vst [vmem:[%s574_s17 + $0x30] sm:$0xff] %v367_v0 }
  0x22   : > { %376 = vst [vmem:[%s574_s17 + $0x38] sm:$0xff] %v368_v6 }
  0x23 PF: > { %s16_s21 = sadd.s32 1, %s476_s21  }
  0x24   : > { %p13_p4 = scmp.ge.s32.totalorder %s16_s21, 4  }
  0x26   :  { %15 = sbr.rel (!%p13_p4) target bundleno = 1 (0x1), region = 77 }

</bundles_post_ra>
